<compile_context>
chip_gen: v5e
topology: v5e:2x2
jax: 0.10.0
libtpu: 0.0.40
codegen_flags: <defaults>
</compile_context>

<pallas_src>
import numpy as np
import jax
import jax.numpy as jnp
from jax.experimental import pallas as pl
from jax.experimental.pallas import tpu as pltpu


def _round_up(x: int, m: int) -> int:
    return ((x + m - 1) // m) * m


def _cnn_sizes(in_dim: int, out_dim: int, n_layers: int):
    """Replicates the logspace channel schedule from the PyTorch module."""
    sizes = np.logspace(np.log2(in_dim), np.log2(out_dim), base=2,
                        num=n_layers + 1, dtype=int).tolist()
    sizes[0] = in_dim
    sizes[-1] = out_dim
    return sizes


def init_cnn_params(key, in_dim: int, out_dim: int, n_layers: int,
                    dtype=jnp.float32):
    """PyTorch-style Conv1d init: U(-k, k) with k = 1/sqrt(in_channels * 3)."""
    sizes = _cnn_sizes(in_dim, out_dim, n_layers)
    params = []
    for idx in range(len(sizes) - 1):
        c_in, c_out = sizes[idx], sizes[idx + 1]
        key, kw, kb = jax.random.split(key, 3)
        bound = 1.0 / np.sqrt(c_in * 3)
        w = jax.random.uniform(kw, (c_out, c_in, 3), dtype,
                               minval=-bound, maxval=bound)
        b = jax.random.uniform(kb, (c_out,), dtype,
                               minval=-bound, maxval=bound)
        params.append((w, b))
    return params, sizes


def _chip_info():
    """Best-effort TPU generation detection (trace-time, Python level).

    Returns (is_v5e, has_two_tensorcores)."""
    kind = ""
    try:
        d = jax.devices()[0]
        if d.platform == "tpu":
            kind = (getattr(d, "device_kind", "") or "").lower()
    except Exception:
        pass
    is_v5e = ("v5 lite" in kind) or ("v5e" in kind) or ("v5litepod" in kind)
    two_tc = ("v7" in kind) or ("7x" in kind)     # v7x: 2 TensorCores / chip
    return is_v5e, two_tc


def prepare_cnn_params(params, in_dim: int, compute_dtype=jnp.bfloat16):
    """One-time weight preparation, hoisted out of the forward path.

    Conv1d(k=3, pad=1) on a length-1 sequence only sees the center tap, so
    each layer is a Linear with weight W[:, :, 1].  Weights are transposed to
    [in, out] and zero-padded so every OUT dim is a lane-dense multiple of
    128; the IN dim of layer i>=1 is padded to match the previous layer's
    padded output, while layer 0 keeps its natural in_dim rows so the
    activation input needs no feature padding at all.  Biases are stacked
    into a single [n_layers, max_out_pad] f32 array.
    """
    n_linear = len(params)
    c_outs = [int(w.shape[0]) for (w, _) in params]
    c_ins = [int(w.shape[1]) for (w, _) in params]
    assert c_ins[0] == in_dim
    out_pads = [_round_up(c, 128) for c in c_outs]
    k_dims = [in_dim] + out_pads[:-1]
    max_op = max(out_pads)

    weights = []
    bias_stack = np.zeros((n_linear, max_op), np.float32)
    for i, (w, b) in enumerate(params):
        w_center = np.asarray(w[:, :, 1], np.float32).T          # [c_in, c_out]
        wp = np.zeros((k_dims[i], out_pads[i]), np.float32)
        wp[:c_ins[i], :c_outs[i]] = w_center
        weights.append(jnp.asarray(wp, dtype=compute_dtype))
        bias_stack[i, :c_outs[i]] = np.asarray(b, np.float32)

    return {
        "weights": weights,                  # list of [k_i, out_pad_i], compute dtype
        "bias_stack": jnp.asarray(bias_stack),   # [n_layers, max_op], f32
        "k_dims": k_dims,
        "out_pads": out_pads,
        "out_dim": c_outs[-1],
        "compute_dtype": compute_dtype,
    }


def _make_cnn_kernel(n_linear: int, out_pads, compute_dtype):
    """Fused body: n_linear Linear (= Conv1d center tap) layers, ReLU between."""
    def kernel(x_ref, *refs):
        # refs = (w0, w1, ..., w_{n-1}, bias_stack, out_ref)
        b_ref = refs[n_linear]
        out_ref = refs[-1]
        bias_all = b_ref[...]                      # [n_layers, max_op] f32, tiny
        h = x_ref[...].astype(compute_dtype)       # in-kernel cast (no wrapper pass)
        for i in range(n_linear):
            acc = jnp.dot(h, refs[i][...],
                          preferred_element_type=jnp.float32)    # MXU, f32 acc
            acc = acc + bias_all[i, :out_pads[i]][None, :]        # bias add in f32
            if i != n_linear - 1:
                acc = jnp.maximum(acc, 0.0)                       # ReLU in f32 (VPU)
                h = acc.astype(compute_dtype)                     # back to MXU dtype
            else:
                h = acc
        out_ref[...] = h.astype(out_ref.dtype)     # lane-dense 128-wide store
    return kernel


def cnn_forward_pallas(x, prepared, *, batch_tile=None, unpad=True):
    """x: [batch, in_dim] -> [batch, out_dim] via one fused Pallas call.

    Set unpad=False to get the padded (batch, out_pad) array and avoid the
    wrapper-side slice when the consumer can slice lazily itself.
    """
    batch, in_dim = x.shape
    weights = prepared["weights"]
    bias_stack = prepared["bias_stack"]
    k_dims = prepared["k_dims"]
    out_pads = prepared["out_pads"]
    out_dim = prepared["out_dim"]
    compute_dtype = prepared["compute_dtype"]
    n_linear = len(weights)
    out_pad = out_pads[-1]
    max_op = max(out_pads)
    assert in_dim == k_dims[0], (in_dim, k_dims[0])

    is_v5e, two_tc = _chip_info()
    # v5e has one vector-store slot; cap its tile so the f32 intermediates'
    # store traffic stays under the DMA slack.  v6e/v7x default to 1024.
    cap = 512 if is_v5e else 1024
    if batch_tile is None:
        bt = cap
    else:
        bt = min(int(batch_tile), cap) if is_v5e else int(batch_tile)
    bt = max(8, bt)

    if batch <= bt:
        if two_tc and batch >= 256:
            # Dual TensorCore chip (v7x): give the "parallel" batch axis two
            # grid steps so both cores get work.
            tb = _round_up(pl.cdiv(batch, 2), 8)
        else:
            # Single block; a full-dim block is legal even when not %8.
            tb = batch
    else:
        tb = _round_up(bt, 8)
    grid = (pl.cdiv(batch, tb),)          # ragged last block: stores are masked

    def _const_spec(shape, wmode):
        if wmode is None:
            return pl.BlockSpec(shape, lambda i: (0, 0))
        return pl.BlockSpec(shape, lambda i: (0, 0), pipeline_mode=wmode)

    def _build_and_call(single_buffer_weights):
        wmode = pl.Buffered(1) if single_buffer_weights else None
        in_specs = [pl.BlockSpec((tb, in_dim), lambda i: (i, 0))]
        for li in range(n_linear):
            in_specs.append(_const_spec((k_dims[li], out_pads[li]), wmode))
        in_specs.append(_const_spec((n_linear, max_op), wmode))
        out_spec = pl.BlockSpec((tb, out_pad), lambda i: (i, 0))

        # vmem limit from the actual footprint (VMEM lane-pads to 128).
        cd_size = jnp.dtype(compute_dtype).itemsize
        in_cols = _round_up(in_dim, 128)
        w_bytes = sum(int(np.prod(w.shape)) * cd_size for w in weights)
        b_bytes = int(bias_stack.size) * 4
        wbuf = 1 if single_buffer_weights else 2
        vmem_limit = int(
            2 * tb * in_cols * x.dtype.itemsize       # double-buffered input tiles
            + 2 * tb * out_pad * x.dtype.itemsize     # double-buffered output tiles
            + wbuf * (w_bytes + b_bytes)              # constant-index weights + bias
            + 2 * tb * max_op * 4                     # f32 intermediates / spill room
            + (2 << 20))                              # slack
        vmem_limit = min(max(vmem_limit, 8 << 20), 96 << 20)

        fn = pl.pallas_call(
            _make_cnn_kernel(n_linear, out_pads, compute_dtype),
            out_shape=jax.ShapeDtypeStruct((batch, out_pad), x.dtype),
            grid=grid,
            in_specs=in_specs,
            out_specs=out_spec,
            compiler_params=pltpu.CompilerParams(
                dimension_semantics=("parallel",),
                vmem_limit_bytes=vmem_limit),
        )
        return fn(x, *weights, bias_stack)

    try:
        # Weights/bias have constant index maps -> fetched once; single-buffer
        # them to drop the redundant second VMEM buffer (v7x: 64 MiB VMEM).
        out = _build_and_call(True)
    except Exception:
        # Fallback for jax versions without pipeline_mode=pl.Buffered support.
        out = _build_and_call(False)

    if not unpad:
        return out
    if out_pad == out_dim and out.shape[0] == batch:
        return out
    return out[:, :out_dim]


def cnn_module_forward(inputs: dict, prepared, **kwargs):
    """Mirrors CNN.forward: dict in, dict out. Dropout = identity (eval)."""
    sindy_loss = inputs.get("sindy_loss", None)
    x = inputs["final_hidden_state"]
    # unsqueeze(-1) -> Conv1d(k=3, pad=1) chain -> squeeze(-1) on a length-1
    # sequence, fused into one Pallas call.
    out = cnn_forward_pallas(x, prepared, **kwargs)
    # TODO(synk): training-mode stochastic dropout not implemented (identity).
    return {"output": out, "sindy_loss": sindy_loss}


def _reference_forward(x, params):
    """Plain-JAX reference: the actual Conv1d(k=3, pad=1) chain on length-1 input."""
    h = x[:, :, None].astype(jnp.float32)            # [B, C, L=1]
    n = len(params)
    for i, (w, b) in enumerate(params):
        h = jax.lax.conv_general_dilated(
            h, w.astype(jnp.float32), window_strides=(1,), padding=((1, 1),),
            dimension_numbers=("NCH", "OIH", "NCH"))
        h = h + b[None, :, None]
        if i != n - 1:
            h = jnp.maximum(h, 0.0)
    return h[:, :, 0]


if __name__ == "__main__":
    key = jax.random.PRNGKey(0)
    k_param, k_x, k_x2 = jax.random.split(key, 3)

    in_dim, out_dim, n_layers, batch = 32, 8, 3, 16
    params, sizes = init_cnn_params(k_param, in_dim, out_dim, n_layers)
    x = jax.random.normal(k_x, (batch, in_dim), jnp.float32)
    inputs = {"final_hidden_state": x, "sindy_loss": jnp.float32(0.0)}

    ref = _reference_forward(x, params)

    # f32 MXU operands: check against the true Conv1d reference.
    prep_f32 = prepare_cnn_params(params, in_dim, compute_dtype=jnp.float32)
    res32 = cnn_module_forward(inputs, prep_f32)
    out32 = jax.block_until_ready(res32["output"])
    assert out32.shape == (batch, out_dim), out32.shape
    np.testing.assert_allclose(np.asarray(out32), np.asarray(ref),
                               rtol=1e-2, atol=1e-2)

    # Default bf16 MXU operands + f32 accumulation: looser tolerance.
    prep_bf16 = prepare_cnn_params(params, in_dim)
    resbf = cnn_module_forward(inputs, prep_bf16)
    outbf = jax.block_until_ready(resbf["output"])
    assert outbf.shape == (batch, out_dim), outbf.shape
    np.testing.assert_allclose(np.asarray(outbf), np.asarray(ref),
                               rtol=5e-2, atol=5e-2)

    # Multi-step, ragged batch (exercises the grid pipeline + masked edge block).
    batch2 = 300
    x2 = jax.random.normal(k_x2, (batch2, in_dim), jnp.float32)
    out2 = jax.block_until_ready(
        cnn_forward_pallas(x2, prep_f32, batch_tile=128))
    ref2 = _reference_forward(x2, params)
    assert out2.shape == (batch2, out_dim), out2.shape
    np.testing.assert_allclose(np.asarray(out2), np.asarray(ref2),
                               rtol=1e-2, atol=1e-2)

    print("KERNEL_OK")
</pallas_src>

<mosaic_0001>
module attributes {stable_mosaic.version = 11 : i64} {
  func.func @kernel(%arg0: i32, %arg1: memref<16x32xf32, #tpu.memory_space<vmem>>, %arg2: memref<32x128xf32, #tpu.memory_space<vmem>>, %arg3: memref<128x128xf32, #tpu.memory_space<vmem>>, %arg4: memref<128x128xf32, #tpu.memory_space<vmem>>, %arg5: memref<3x128xf32, #tpu.memory_space<vmem>>, %arg6: memref<16x128xf32, #tpu.memory_space<vmem>>) attributes {dimension_semantics = [#tpu.dimension_semantics<parallel>], iteration_bounds = array<i64: 1>, scalar_prefetch = 0 : i64, scratch_operands = 0 : i64, tpu.core_type = #tpu.core_type<tc>, window_params = [{transform_indices = @transform_0, window_bounds = array<i64: 16, 32>}, {pipeline_mode = #tpu.pipeline_mode<synchronous>, transform_indices = @transform_1, window_bounds = array<i64: 32, 128>}, {pipeline_mode = #tpu.pipeline_mode<synchronous>, transform_indices = @transform_2, window_bounds = array<i64: 128, 128>}, {pipeline_mode = #tpu.pipeline_mode<synchronous>, transform_indices = @transform_3, window_bounds = array<i64: 128, 128>}, {pipeline_mode = #tpu.pipeline_mode<synchronous>, transform_indices = @transform_4, window_bounds = array<i64: 3, 128>}, {transform_indices = @transform_5, window_bounds = array<i64: 16, 128>}]} {
    %c0 = arith.constant 0 : index
    %c0_0 = arith.constant 0 : index
    %0 = vector.load %arg5[%c0, %c0_0] : memref<3x128xf32, #tpu.memory_space<vmem>>, vector<3x128xf32>
    %c0_1 = arith.constant 0 : index
    %c0_2 = arith.constant 0 : index
    %1 = vector.load %arg1[%c0_1, %c0_2] : memref<16x32xf32, #tpu.memory_space<vmem>>, vector<16x32xf32>
    %c0_3 = arith.constant 0 : index
    %c0_4 = arith.constant 0 : index
    %2 = vector.load %arg2[%c0_3, %c0_4] : memref<32x128xf32, #tpu.memory_space<vmem>>, vector<32x128xf32>
    %cst = arith.constant dense<0.000000e+00> : vector<16x128xf32>
    %3 = tpu.matmul %1, %2, %cst {dimension_numbers = #tpu.dot_dimension_numbers<[1], [0], [0], [1], [0, 0, 1, 1], [], []>} : vector<16x32xf32>, vector<32x128xf32>, vector<16x128xf32> -> vector<16x128xf32>
    %4 = vector.extract_strided_slice %0 {offsets = [0, 0], sizes = [1, 128], strides = [1, 1]} : vector<3x128xf32> to vector<1x128xf32>
    %5 = vector.shape_cast %4 : vector<1x128xf32> to vector<128xf32>
    %6 = vector.shape_cast %5 : vector<128xf32> to vector<1x128xf32>
    %7 = vector.broadcast %6 : vector<1x128xf32> to vector<16x128xf32>
    %8 = arith.addf %3, %7 : vector<16x128xf32>
    %cst_5 = arith.constant 0.000000e+00 : f32
    %9 = vector.broadcast %cst_5 : f32 to vector<16x128xf32>
    %10 = arith.maximumf %8, %9 : vector<16x128xf32>
    %c0_6 = arith.constant 0 : index
    %c0_7 = arith.constant 0 : index
    %11 = vector.load %arg3[%c0_6, %c0_7] : memref<128x128xf32, #tpu.memory_space<vmem>>, vector<128x128xf32>
    %cst_8 = arith.constant dense<0.000000e+00> : vector<16x128xf32>
    %12 = tpu.matmul %10, %11, %cst_8 {dimension_numbers = #tpu.dot_dimension_numbers<[1], [0], [0], [1], [0, 0, 1, 1], [], []>} : vector<16x128xf32>, vector<128x128xf32>, vector<16x128xf32> -> vector<16x128xf32>
    %13 = vector.extract_strided_slice %0 {offsets = [1, 0], sizes = [1, 128], strides = [1, 1]} : vector<3x128xf32> to vector<1x128xf32>
    %14 = vector.shape_cast %13 : vector<1x128xf32> to vector<128xf32>
    %15 = vector.shape_cast %14 : vector<128xf32> to vector<1x128xf32>
    %16 = vector.broadcast %15 : vector<1x128xf32> to vector<16x128xf32>
    %17 = arith.addf %12, %16 : vector<16x128xf32>
    %cst_9 = arith.constant 0.000000e+00 : f32
    %18 = vector.broadcast %cst_9 : f32 to vector<16x128xf32>
    %19 = arith.maximumf %17, %18 : vector<16x128xf32>
    %c0_10 = arith.constant 0 : index
    %c0_11 = arith.constant 0 : index
    %20 = vector.load %arg4[%c0_10, %c0_11] : memref<128x128xf32, #tpu.memory_space<vmem>>, vector<128x128xf32>
    %cst_12 = arith.constant dense<0.000000e+00> : vector<16x128xf32>
    %21 = tpu.matmul %19, %20, %cst_12 {dimension_numbers = #tpu.dot_dimension_numbers<[1], [0], [0], [1], [0, 0, 1, 1], [], []>} : vector<16x128xf32>, vector<128x128xf32>, vector<16x128xf32> -> vector<16x128xf32>
    %22 = vector.extract_strided_slice %0 {offsets = [2, 0], sizes = [1, 128], strides = [1, 1]} : vector<3x128xf32> to vector<1x128xf32>
    %23 = vector.shape_cast %22 : vector<1x128xf32> to vector<128xf32>
    %24 = vector.shape_cast %23 : vector<128xf32> to vector<1x128xf32>
    %25 = vector.broadcast %24 : vector<1x128xf32> to vector<16x128xf32>
    %26 = arith.addf %21, %25 : vector<16x128xf32>
    %c0_13 = arith.constant 0 : index
    %c0_14 = arith.constant 0 : index
    %27 = vector.load %arg6[%c0_13, %c0_14] : memref<16x128xf32, #tpu.memory_space<vmem>>, vector<16x128xf32>
    tpu.vector_store %arg6[%c0_13, %c0_14], %26 {strides = array<i32>} : memref<16x128xf32, #tpu.memory_space<vmem>>, vector<16x128xf32>,
    return
  }
  func.func @transform_0(%arg0: i32) -> (i32, i32) {
    %c0_i32 = arith.constant 0 : i32
    %c0_i32_0 = arith.constant 0 : i32
    return %arg0, %c0_i32 : i32, i32
  }
  func.func @transform_1(%arg0: i32) -> (i32, i32) {
    %c0_i32 = arith.constant 0 : i32
    %c0_i32_0 = arith.constant 0 : i32
    %c0_i32_1 = arith.constant 0 : i32
    return %c0_i32, %c0_i32_0 : i32, i32
  }
  func.func @transform_2(%arg0: i32) -> (i32, i32) {
    %c0_i32 = arith.constant 0 : i32
    %c0_i32_0 = arith.constant 0 : i32
    %c0_i32_1 = arith.constant 0 : i32
    return %c0_i32, %c0_i32_0 : i32, i32
  }
  func.func @transform_3(%arg0: i32) -> (i32, i32) {
    %c0_i32 = arith.constant 0 : i32
    %c0_i32_0 = arith.constant 0 : i32
    %c0_i32_1 = arith.constant 0 : i32
    return %c0_i32, %c0_i32_0 : i32, i32
  }
  func.func @transform_4(%arg0: i32) -> (i32, i32) {
    %c0_i32 = arith.constant 0 : i32
    %c0_i32_0 = arith.constant 0 : i32
    %c0_i32_1 = arith.constant 0 : i32
    return %c0_i32, %c0_i32_0 : i32, i32
  }
  func.func @transform_5(%arg0: i32) -> (i32, i32) {
    %c0_i32 = arith.constant 0 : i32
    %c0_i32_0 = arith.constant 0 : i32
    return %arg0, %c0_i32 : i32, i32
  }
}

module attributes {stable_mosaic.version = 11 : i64} {
  func.func @kernel(%arg0: i32, %arg1: memref<16x32xf32, #tpu.memory_space<vmem>>, %arg2: memref<32x128xf32, #tpu.memory_space<vmem>>, %arg3: memref<128x128xf32, #tpu.memory_space<vmem>>, %arg4: memref<128x128xf32, #tpu.memory_space<vmem>>, %arg5: memref<3x128xf32, #tpu.memory_space<vmem>>, %arg6: memref<16x128xf32, #tpu.memory_space<vmem>>) attributes {dimension_semantics = [#tpu.dimension_semantics<parallel>], iteration_bounds = array<i64: 1>, scalar_prefetch = 0 : i64, scratch_operands = 0 : i64, tpu.core_type = #tpu.core_type<tc>, window_params = [{transform_indices = @transform_0, window_bounds = array<i64: 16, 32>}, {pipeline_mode = #tpu.pipeline_mode<synchronous>, transform_indices = @transform_1, window_bounds = array<i64: 32, 128>}, {pipeline_mode = #tpu.pipeline_mode<synchronous>, transform_indices = @transform_2, window_bounds = array<i64: 128, 128>}, {pipeline_mode = #tpu.pipeline_mode<synchronous>, transform_indices = @transform_3, window_bounds = array<i64: 128, 128>}, {pipeline_mode = #tpu.pipeline_mode<synchronous>, transform_indices = @transform_4, window_bounds = array<i64: 3, 128>}, {transform_indices = @transform_5, window_bounds = array<i64: 16, 128>}]} {
    %c0 = arith.constant 0 : index
    %c0_0 = arith.constant 0 : index
    %0 = vector.load %arg5[%c0, %c0_0] : memref<3x128xf32, #tpu.memory_space<vmem>>, vector<3x128xf32>
    %c0_1 = arith.constant 0 : index
    %c0_2 = arith.constant 0 : index
    %1 = vector.load %arg1[%c0_1, %c0_2] : memref<16x32xf32, #tpu.memory_space<vmem>>, vector<16x32xf32>
    %c0_3 = arith.constant 0 : index
    %c0_4 = arith.constant 0 : index
    %2 = vector.load %arg2[%c0_3, %c0_4] : memref<32x128xf32, #tpu.memory_space<vmem>>, vector<32x128xf32>
    %cst = arith.constant dense<0.000000e+00> : vector<16x128xf32>
    %3 = tpu.matmul %1, %2, %cst {dimension_numbers = #tpu.dot_dimension_numbers<[1], [0], [0], [1], [0, 0, 1, 1], [], []>} : vector<16x32xf32>, vector<32x128xf32>, vector<16x128xf32> -> vector<16x128xf32>
    %4 = vector.extract_strided_slice %0 {offsets = [0, 0], sizes = [1, 128], strides = [1, 1]} : vector<3x128xf32> to vector<1x128xf32>
    %5 = vector.shape_cast %4 : vector<1x128xf32> to vector<128xf32>
    %6 = vector.shape_cast %5 : vector<128xf32> to vector<1x128xf32>
    %7 = vector.broadcast %6 : vector<1x128xf32> to vector<16x128xf32>
    %8 = arith.addf %3, %7 : vector<16x128xf32>
    %cst_5 = arith.constant 0.000000e+00 : f32
    %9 = vector.broadcast %cst_5 : f32 to vector<16x128xf32>
    %10 = arith.maximumf %8, %9 : vector<16x128xf32>
    %c0_6 = arith.constant 0 : index
    %c0_7 = arith.constant 0 : index
    %11 = vector.load %arg3[%c0_6, %c0_7] : memref<128x128xf32, #tpu.memory_space<vmem>>, vector<128x128xf32>
    %cst_8 = arith.constant dense<0.000000e+00> : vector<16x128xf32>
    %12 = tpu.matmul %10, %11, %cst_8 {dimension_numbers = #tpu.dot_dimension_numbers<[1], [0], [0], [1], [0, 0, 1, 1], [], []>} : vector<16x128xf32>, vector<128x128xf32>, vector<16x128xf32> -> vector<16x128xf32>
    %13 = vector.extract_strided_slice %0 {offsets = [1, 0], sizes = [1, 128], strides = [1, 1]} : vector<3x128xf32> to vector<1x128xf32>
    %14 = vector.shape_cast %13 : vector<1x128xf32> to vector<128xf32>
    %15 = vector.shape_cast %14 : vector<128xf32> to vector<1x128xf32>
    %16 = vector.broadcast %15 : vector<1x128xf32> to vector<16x128xf32>
    %17 = arith.addf %12, %16 : vector<16x128xf32>
    %cst_9 = arith.constant 0.000000e+00 : f32
    %18 = vector.broadcast %cst_9 : f32 to vector<16x128xf32>
    %19 = arith.maximumf %17, %18 : vector<16x128xf32>
    %c0_10 = arith.constant 0 : index
    %c0_11 = arith.constant 0 : index
    %20 = vector.load %arg4[%c0_10, %c0_11] : memref<128x128xf32, #tpu.memory_space<vmem>>, vector<128x128xf32>
    %cst_12 = arith.constant dense<0.000000e+00> : vector<16x128xf32>
    %21 = tpu.matmul %19, %20, %cst_12 {dimension_numbers = #tpu.dot_dimension_numbers<[1], [0], [0], [1], [0, 0, 1, 1], [], []>} : vector<16x128xf32>, vector<128x128xf32>, vector<16x128xf32> -> vector<16x128xf32>
    %22 = vector.extract_strided_slice %0 {offsets = [2, 0], sizes = [1, 128], strides = [1, 1]} : vector<3x128xf32> to vector<1x128xf32>
    %23 = vector.shape_cast %22 : vector<1x128xf32> to vector<128xf32>
    %24 = vector.shape_cast %23 : vector<128xf32> to vector<1x128xf32>
    %25 = vector.broadcast %24 : vector<1x128xf32> to vector<16x128xf32>
    %26 = arith.addf %21, %25 : vector<16x128xf32>
    %c0_13 = arith.constant 0 : index
    %c0_14 = arith.constant 0 : index
    %27 = vector.load %arg6[%c0_13, %c0_14] : memref<16x128xf32, #tpu.memory_space<vmem>>, vector<16x128xf32>
    tpu.vector_store %arg6[%c0_13, %c0_14], %26 {strides = array<i32>} : memref<16x128xf32, #tpu.memory_space<vmem>>, vector<16x128xf32>,
    return
  }
  func.func @transform_0(%arg0: i32) -> (i32, i32) {
    %c0_i32 = arith.constant 0 : i32
    %c0_i32_0 = arith.constant 0 : i32
    return %arg0, %c0_i32 : i32, i32
  }
  func.func @transform_1(%arg0: i32) -> (i32, i32) {
    %c0_i32 = arith.constant 0 : i32
    %c0_i32_0 = arith.constant 0 : i32
    %c0_i32_1 = arith.constant 0 : i32
    return %c0_i32, %c0_i32_0 : i32, i32
  }
  func.func @transform_2(%arg0: i32) -> (i32, i32) {
    %c0_i32 = arith.constant 0 : i32
    %c0_i32_0 = arith.constant 0 : i32
    %c0_i32_1 = arith.constant 0 : i32
    return %c0_i32, %c0_i32_0 : i32, i32
  }
  func.func @transform_3(%arg0: i32) -> (i32, i32) {
    %c0_i32 = arith.constant 0 : i32
    %c0_i32_0 = arith.constant 0 : i32
    %c0_i32_1 = arith.constant 0 : i32
    return %c0_i32, %c0_i32_0 : i32, i32
  }
  func.func @transform_4(%arg0: i32) -> (i32, i32) {
    %c0_i32 = arith.constant 0 : i32
    %c0_i32_0 = arith.constant 0 : i32
    %c0_i32_1 = arith.constant 0 : i32
    return %c0_i32, %c0_i32_0 : i32, i32
  }
  func.func @transform_5(%arg0: i32) -> (i32, i32) {
    %c0_i32 = arith.constant 0 : i32
    %c0_i32_0 = arith.constant 0 : i32
    return %arg0, %c0_i32 : i32, i32
  }
}

</mosaic_0001>

<bundles_post_ra>
// kernel: tpu_custom_call.1
= control target key start
LH: loop header
LB: loop body
LE: loop exit
PB: predicated region body
PF: predicated region fallthrough
CT: control target
= control target key end

     0   :  { %10 = vsyncpa [#allocation3], 0  ;;  %s493_s0 = inlined_call_operand.hbm [shape: f32[16,32], index: 0, kind: input, shape index: {}]   ;;  %s494_s1 = inlined_call_operand.hbm [shape: f32[32,128], index: 1, kind: input, shape index: {}]   ;;  %s495_s2 = inlined_call_operand.hbm [shape: f32[128,128], index: 2, kind: input, shape index: {}]   ;;  %s496_s3 = inlined_call_operand.hbm [shape: f32[128,128], index: 3, kind: input, shape index: {}]   ;;  %s497_s4 = inlined_call_operand.hbm [shape: f32[3,128], index: 4, kind: input, shape index: {}]   ;;  %s498_s5 = inlined_call_operand.hbm [shape: f32[16,128], index: 5, kind: output, shape index: {}]  }
   0x1   :  { %11 = vsyncpa [#allocation6], 0 }
   0x2   :  { %12 = vsyncpa [#allocation9], 0 }
   0x3   :  { %13 = vsyncpa [#allocation4], 0  ;;  %s31_s20 = sshll.u32 %s494_s1, 4  ;;  %s420_s21 = smov [#allocation5]   ;;  %s32_s20 = int_to_ptr.hbm [resolvable:$true] %s31_s20 }
   0x4   :  { %s33_s22 = sshll.u32 %s420_s21, 4  ;;  %s57_s25 = sshll.u32 %s496_s3, 4  ;;  %s34_s22 = int_to_ptr.vmem [resolvable:$true] %s33_s22  ;;  %s58_s25 = int_to_ptr.hbm [resolvable:$true] %s57_s25 }
   0x5   :  { %s421_s26 = smov 128   ;;  %s422_s27 = smov 8  }
   0x6   :  { %39 = dma.hbm_to_vmem [thread:$0]  %s32_s20, 512, %s34_s22, [#allocation6], %s421_s26, %s421_s26, %s422_s27  }
   0x7   :  { %s423_s28 = smov [#allocation8]   ;;  %s18_s1 = sshll.u32 %s493_s0, 4  ;;  %s19_s1 = int_to_ptr.hbm [resolvable:$true] %s18_s1 }
   0x8   :  { %s59_s29 = sshll.u32 %s423_s28, 4  ;;  %s44_s8 = sshll.u32 %s495_s2, 4  ;;  %s60_s29 = int_to_ptr.vmem [resolvable:$true] %s59_s29  ;;  %s45_s8 = int_to_ptr.hbm [resolvable:$true] %s44_s8 }
   0x9   :  { %65 = dma.hbm_to_vmem [thread:$0]  %s58_s25, 2048, %s60_s29, [#allocation9], %s421_s26, %s421_s26, %s422_s27  }
   0xa   :  { %s424_s9 = smov [#allocation2]   ;;  %s425_s11 = smov [#allocation7]  }
   0xb   :  { %s20_s10 = sshll.u32 %s424_s9, 4  ;;  %s46_s0 = sshll.u32 %s425_s11, 4  ;;  %s21_s10 = int_to_ptr.vmem [resolvable:$true] %s20_s10  ;;  %s47_s0 = int_to_ptr.vmem [resolvable:$true] %s46_s0 }
   0xc   :  { %26 = dma.hbm_to_vmem [thread:$0]  %s19_s1, 256, %s21_s10, [#allocation3], %s421_s26, %s421_s26, %s422_s27  }
   0xd   :  { %s71_s14 = sshll.u32 %s497_s4, 4  ;;  %s426_s2 = smov [#allocation10]   ;;  %s72_s14 = int_to_ptr.hbm [resolvable:$true] %s71_s14 }
   0xe   :  { %52 = dma.hbm_to_vmem [thread:$0]  %s45_s8, 2048, %s47_s0, [#allocation6], %s421_s26, %s421_s26, %s422_s27  }
   0xf   :  { %s73_s15 = sshll.u32 %s426_s2, 4  ;;  %s74_s15 = int_to_ptr.vmem [resolvable:$true] %s73_s15 }
  0x10   :  { %76 = dma.hbm_to_vmem [thread:$0]  %s72_s14, 64, %s74_s15, [#allocation9]  }
  0x11   :  { %412 = dma.done.wait [#allocation3], 256  }
  0x12   :  { %413 = vsyncadd [#allocation3], 4294967040 }
  0x13   :  { %414 = dma.done.wait [#allocation6], 2560  }
  0x14   :  { %415 = vsyncadd [#allocation6], 4294964736 }
  0x15   :  { %416 = dma.done.wait [#allocation9], 2112  }
  0x16   :  { %417 = vsyncadd [#allocation9], 4294965184  ;;  %v103_v0 = vld [vmem:[#allocation5 + $0x18] sm:$0xff]  ;;  %v102_v1 = vld [vmem:[#allocation5 + $0x10] sm:$0xff]  ;;  %vm105_vm0 = vcmask 261120   ;;  %s427_s4 = smov [#allocation11]  }
  0x17   :  { %124 = vmatpush.msra.mxu0 %v103_v0  ;;  %v101_v2 = vld [vmem:[#allocation5 + $0x8] sm:$0xff]  ;;  %v152_v3 = vld [vmem:[#allocation7 + $0x78] sm:$0xff]  ;;  %v151_v4 = vld [vmem:[#allocation7 + $0x70] sm:$0xff]  ;;  %s225_s16 = sshll.u32 %s427_s4, 4  ;;  %s227_s19 = sshll.u32 %s498_s5, 4  ;;  %s226_s16 = int_to_ptr.vmem [resolvable:$true] %s225_s16  ;;  %s228_s19 = int_to_ptr.hbm [resolvable:$true] %s227_s19 }
  0x18   :  { %154 = vmatpush.msra.mxu1 %v152_v3  ;;  %v100_v5 = vld [vmem:[#allocation5] sm:$0xff]  ;;  %v150_v6 = vld [vmem:[#allocation7 + $0x68] sm:$0xff]  ;;  %244 = vmatpush.msra.mxu3 %v152_v3  ;;  %v98_v7 = vld [vmem:[#allocation2] sm:$0xff] }
  0x19   :  { %125 = vmatpush.msra.mxu0 %v102_v1  ;;  %v149_v8 = vld [vmem:[#allocation7 + $0x60] sm:$0xff]  ;;  %v148_v9 = vld [vmem:[#allocation7 + $0x58] sm:$0xff]  ;;  %v147_v10 = vld [vmem:[#allocation7 + $0x50] sm:$0xff] }
  0x1a   :  { %155 = vmatpush.msra.mxu1 %v151_v4  ;;  %245 = vmatpush.msra.mxu3 %v151_v4  ;;  %v146_v11 = vld [vmem:[#allocation7 + $0x48] sm:$0xff]  ;;  %v99_v12 = vld [vmem:[#allocation2 + $0x8] sm:$0xff]  ;;  %v145_v13 = vld [vmem:[#allocation7 + $0x40] sm:$0xff] }
  0x1b   :  { %126 = vmatpush.msra.mxu0 %v101_v2  ;;  %v144_v14 = vld [vmem:[#allocation7 + $0x38] sm:$0xff]  ;;  %v143_v15 = vld [vmem:[#allocation7 + $0x30] sm:$0xff]  ;;  %v142_v16 = vld [vmem:[#allocation7 + $0x28] sm:$0xff] }
  0x1c   :  { %156 = vmatpush.msra.mxu1 %v150_v6  ;;  %246 = vmatpush.msra.mxu3 %v150_v6  ;;  %v141_v17 = vld [vmem:[#allocation7 + $0x20] sm:$0xff]  ;;  %v140_v18 = vld [vmem:[#allocation7 + $0x18] sm:$0xff]  ;;  %v139_v19 = vld [vmem:[#allocation7 + $0x10] sm:$0xff] }
  0x1d   :  { %127 = vmatpush.msra.mxu0 %v100_v5  ;;  %v138_v20 = vld [vmem:[#allocation7 + $0x8] sm:$0xff]  ;;  %v137_v21 = vld [vmem:[#allocation7] sm:$0xff]  ;;  %v194_v22 = vld [vmem:[#allocation8 + $0x78] sm:$0xff] }
  0x1e   :  { %242 = vmatmul.msk.f32.vlgmr.msra.gmra.mxu0 %vm105_vm0, %v98_v7  ;;  %157 = vmatpush.msra.mxu1 %v149_v8  ;;  %v193_v23 = vld [vmem:[#allocation8 + $0x70] sm:$0xff]  ;;  %v192_v24 = vld [vmem:[#allocation8 + $0x68] sm:$0xff]  ;;  %v191_v25 = vld [vmem:[#allocation8 + $0x60] sm:$0xff] }
  0x1f   :  { %247 = vmatpush.msra.mxu3 %v149_v8  ;;  %196 = vmatpush.msra.mxu2 %v194_v22  ;;  %v190_v26 = vld [vmem:[#allocation8 + $0x58] sm:$0xff]  ;;  %v189_v27 = vld [vmem:[#allocation8 + $0x50] sm:$0xff]  ;;  %v188_v28 = vld [vmem:[#allocation8 + $0x48] sm:$0xff] }
  0x20   :  { %158 = vmatpush.msra.mxu1 %v148_v9  ;;  %v187_v29 = vld [vmem:[#allocation8 + $0x40] sm:$0xff]  ;;  %v186_v31 = vld [vmem:[#allocation8 + $0x38] sm:$0xff]  ;;  %v185_v33 = vld [vmem:[#allocation8 + $0x30] sm:$0xff] }
  0x21   :  { %248 = vmatpush.msra.mxu3 %v148_v9  ;;  %197 = vmatpush.msra.mxu2 %v193_v23  ;;  %v97_v30 = vld [vmem:[#allocation10] sm:$0x7]  ;;  %v184_v34 = vld [vmem:[#allocation8 + $0x28] sm:$0xff]  ;;  %v182_v39 = vld [vmem:[#allocation8 + $0x18] sm:$0xff] }
  0x22   :  { %159 = vmatpush.msra.mxu1 %v147_v10  ;;  %v104_v32 = vperm.slane %v97_v30, 0  ;;  %v183_v37 = vld [vmem:[#allocation8 + $0x20] sm:$0xff]  ;;  %v181_v43 = vld [vmem:[#allocation8 + $0x10] sm:$0xff]  ;;  %v180_v44 = vld [vmem:[#allocation8 + $0x8] sm:$0xff]  ;;  %v153_v46 = vperm.slane %v97_v30, 1  ;;  %v195_v53 = vperm.slane %v97_v30, 2 }
  0x23   :  { %249 = vmatpush.msra.mxu3 %v147_v10  ;;  %198 = vmatpush.msra.mxu2 %v192_v24  ;;  %v179_v45 = vld [vmem:[#allocation8] sm:$0xff] }
  0x24   :  { %160 = vmatpush.msra.mxu1 %v146_v11 }
  0x25   :  { %250 = vmatpush.msra.mxu3 %v146_v11  ;;  %199 = vmatpush.msra.mxu2 %v191_v25 }
  0x26   :  { %243 = vmatmul.msk.f32.gmra.mxu0 %vm105_vm0, %v99_v12  ;;  %161 = vmatpush.msra.mxu1 %v145_v13 }
  0x27   :  { %251 = vmatpush.msra.mxu3 %v145_v13  ;;  %200 = vmatpush.msra.mxu2 %v190_v26 }
  0x28   :  { %162 = vmatpush.msra.mxu1 %v144_v14 }
  0x29   :  { %252 = vmatpush.msra.mxu3 %v144_v14  ;;  %201 = vmatpush.msra.mxu2 %v189_v27 }
  0x2a   :  { %163 = vmatpush.msra.mxu1 %v143_v15 }
  0x2b   :  { %253 = vmatpush.msra.mxu3 %v143_v15  ;;  %202 = vmatpush.msra.mxu2 %v188_v28 }
  0x2c   :  { %164 = vmatpush.msra.mxu1 %v142_v16 }
  0x2d   :  { %254 = vmatpush.msra.mxu3 %v142_v16  ;;  %203 = vmatpush.msra.mxu2 %v187_v29 }
  0x2e   :  { %165 = vmatpush.msra.mxu1 %v141_v17 }
  0x2f   :  { %255 = vmatpush.msra.mxu3 %v141_v17  ;;  %204 = vmatpush.msra.mxu2 %v186_v31 }
  0x30   :  { %166 = vmatpush.msra.mxu1 %v140_v18 }
  0x31   :  { %256 = vmatpush.msra.mxu3 %v140_v18  ;;  %205 = vmatpush.msra.mxu2 %v185_v33 }
  0x32   :  { %167 = vmatpush.msra.mxu1 %v139_v19 }
  0x33   :  { %257 = vmatpush.msra.mxu3 %v139_v19  ;;  %206 = vmatpush.msra.mxu2 %v184_v34 }
  0x34   :  { %168 = vmatpush.msra.mxu1 %v138_v20 }
  0x35   :  { %258 = vmatpush.msra.mxu3 %v138_v20  ;;  %207 = vmatpush.msra.mxu2 %v183_v37 }
  0x36   :  { %169 = vmatpush.msra.mxu1 %v137_v21 }
  0x37   :  { %259 = vmatpush.msra.mxu3 %v137_v21  ;;  %208 = vmatpush.msra.mxu2 %v182_v39 }
  0x39   :  { %209 = vmatpush.msra.mxu2 %v181_v43 }
  0x3b   :  { %210 = vmatpush.msra.mxu2 %v180_v44 }
  0x3d   :  { %211 = vmatpush.msra.mxu2 %v179_v45 }
  0x9b   :  { %v129_v35 = vpop.f32.mrf.mxu0 }
  0x9c   :  { %v130_v36 = vadd.f32 %v129_v35, %v104_v32 }
  0x9e   :  { %v135_v38 = vmax.f32 %v130_v36, 0.0 }
  0xa0   :  { %170 = vmatmul.f32.vlgmr.msra.gmra.mxu1 %v135_v38 }
  0xa3   :  { %v132_v40 = vpop.f32.mrf.mxu0 }
  0xa4   :  { %v133_v41 = vadd.f32 %v132_v40, %v104_v32 }
  0xa6   :  { %v136_v42 = vmax.f32 %v133_v41, 0.0 }
  0xa8   :  { %173 = vmatmul.f32.vlgmr.msra.gmra.mxu3 %v136_v42 }
 0x11d   :  { %v171_v47 = vpop.f32.mrf.mxu1 }
 0x11e   :  { %v172_v48 = vadd.f32 %v171_v47, %v153_v46 }
 0x120   :  { %v177_v49 = vmax.f32 %v172_v48, 0.0 }
 0x122   :  { %212 = vmatmul.f32.vlgmr.msra.gmra.mxu2 %v177_v49 }
 0x12b   :  { %v174_v50 = vpop.f32.mrf.mxu3 }
 0x12c   :  { %v175_v51 = vadd.f32 %v174_v50, %v153_v46 }
 0x12e   :  { %v178_v52 = vmax.f32 %v175_v51, 0.0 }
 0x130   :  { %215 = vmatmul.f32.gmra.mxu2 %v178_v52 }
 0x1a5   :  { %v213_v54 = vpop.f32.mrf.mxu2 }
 0x1a6   :  { %v214_v55 = vadd.f32 %v213_v54, %v195_v53 }
 0x1a8   :  { %219 = vst [vmem:[#allocation11] sm:$0xff] %v214_v55 }
 0x1b3   :  { %v216_v56 = vpop.f32.mrf.mxu2 }
 0x1b4   :  { %v217_v57 = vadd.f32 %v216_v56, %v195_v53 }
 0x1b6   :  { %220 = vst [vmem:[#allocation11 + $0x8] sm:$0xff] %v217_v57 }
 0x1b7   :  { %233 = dma.vmem_to_hbm [thread:$0]  %s226_s16, 256, %s228_s19, [#allocation4], %s421_s26, %s421_s26, %s422_s27  }
 0x1b8   :  { %418 = dma.done.wait [#allocation4], 256  }
 0x1b9   :  { %419 = vsyncadd [#allocation4], 4294967040 }
 0x1ba   :  { %238 = vsyncpa [#allocation3], 1 }
 0x1bb   :  { %239 = vsyncpa [#allocation6], 1 }
 0x1bc   :  { %240 = vsyncpa [#allocation9], 1 }
 0x1bd   :  { %241 = vsyncpa [#allocation4], 1 }

// kernel: tpu_custom_call.1
= control target key start
LH: loop header
LB: loop body
LE: loop exit
PB: predicated region body
PF: predicated region fallthrough
CT: control target
= control target key end

     0   :  { %10 = vsyncpa [#allocation3], 0  ;;  %s493_s0 = inlined_call_operand.hbm [shape: f32[16,32], index: 0, kind: input, shape index: {}]   ;;  %s494_s1 = inlined_call_operand.hbm [shape: f32[32,128], index: 1, kind: input, shape index: {}]   ;;  %s495_s2 = inlined_call_operand.hbm [shape: f32[128,128], index: 2, kind: input, shape index: {}]   ;;  %s496_s3 = inlined_call_operand.hbm [shape: f32[128,128], index: 3, kind: input, shape index: {}]   ;;  %s497_s4 = inlined_call_operand.hbm [shape: f32[3,128], index: 4, kind: input, shape index: {}]   ;;  %s498_s5 = inlined_call_operand.hbm [shape: f32[16,128], index: 5, kind: output, shape index: {}]  }
   0x1   :  { %11 = vsyncpa [#allocation6], 0 }
   0x2   :  { %12 = vsyncpa [#allocation9], 0 }
   0x3   :  { %13 = vsyncpa [#allocation4], 0  ;;  %s31_s20 = sshll.u32 %s494_s1, 4  ;;  %s420_s21 = smov [#allocation5]   ;;  %s32_s20 = int_to_ptr.hbm [resolvable:$true] %s31_s20 }
   0x4   :  { %s33_s22 = sshll.u32 %s420_s21, 4  ;;  %s57_s25 = sshll.u32 %s496_s3, 4  ;;  %s34_s22 = int_to_ptr.vmem [resolvable:$true] %s33_s22  ;;  %s58_s25 = int_to_ptr.hbm [resolvable:$true] %s57_s25 }
   0x5   :  { %s421_s26 = smov 128   ;;  %s422_s27 = smov 8  }
   0x6   :  { %39 = dma.hbm_to_vmem [thread:$0]  %s32_s20, 512, %s34_s22, [#allocation6], %s421_s26, %s421_s26, %s422_s27  }
   0x7   :  { %s423_s28 = smov [#allocation8]   ;;  %s18_s1 = sshll.u32 %s493_s0, 4  ;;  %s19_s1 = int_to_ptr.hbm [resolvable:$true] %s18_s1 }
   0x8   :  { %s59_s29 = sshll.u32 %s423_s28, 4  ;;  %s44_s8 = sshll.u32 %s495_s2, 4  ;;  %s60_s29 = int_to_ptr.vmem [resolvable:$true] %s59_s29  ;;  %s45_s8 = int_to_ptr.hbm [resolvable:$true] %s44_s8 }
   0x9   :  { %65 = dma.hbm_to_vmem [thread:$0]  %s58_s25, 2048, %s60_s29, [#allocation9], %s421_s26, %s421_s26, %s422_s27  }
   0xa   :  { %s424_s9 = smov [#allocation2]   ;;  %s425_s11 = smov [#allocation7]  }
   0xb   :  { %s20_s10 = sshll.u32 %s424_s9, 4  ;;  %s46_s0 = sshll.u32 %s425_s11, 4  ;;  %s21_s10 = int_to_ptr.vmem [resolvable:$true] %s20_s10  ;;  %s47_s0 = int_to_ptr.vmem [resolvable:$true] %s46_s0 }
   0xc   :  { %26 = dma.hbm_to_vmem [thread:$0]  %s19_s1, 256, %s21_s10, [#allocation3], %s421_s26, %s421_s26, %s422_s27  }
   0xd   :  { %s71_s14 = sshll.u32 %s497_s4, 4  ;;  %s426_s2 = smov [#allocation10]   ;;  %s72_s14 = int_to_ptr.hbm [resolvable:$true] %s71_s14 }
   0xe   :  { %52 = dma.hbm_to_vmem [thread:$0]  %s45_s8, 2048, %s47_s0, [#allocation6], %s421_s26, %s421_s26, %s422_s27  }
   0xf   :  { %s73_s15 = sshll.u32 %s426_s2, 4  ;;  %s74_s15 = int_to_ptr.vmem [resolvable:$true] %s73_s15 }
  0x10   :  { %76 = dma.hbm_to_vmem [thread:$0]  %s72_s14, 64, %s74_s15, [#allocation9]  }
  0x11   :  { %412 = dma.done.wait [#allocation3], 256  }
  0x12   :  { %413 = vsyncadd [#allocation3], 4294967040 }
  0x13   :  { %414 = dma.done.wait [#allocation6], 2560  }
  0x14   :  { %415 = vsyncadd [#allocation6], 4294964736 }
  0x15   :  { %416 = dma.done.wait [#allocation9], 2112  }
  0x16   :  { %417 = vsyncadd [#allocation9], 4294965184  ;;  %v103_v0 = vld [vmem:[#allocation5 + $0x18] sm:$0xff]  ;;  %v102_v1 = vld [vmem:[#allocation5 + $0x10] sm:$0xff]  ;;  %vm105_vm0 = vcmask 261120   ;;  %s427_s4 = smov [#allocation11]  }
  0x17   :  { %124 = vmatpush.msra.mxu0 %v103_v0  ;;  %v101_v2 = vld [vmem:[#allocation5 + $0x8] sm:$0xff]  ;;  %v152_v3 = vld [vmem:[#allocation7 + $0x78] sm:$0xff]  ;;  %v151_v4 = vld [vmem:[#allocation7 + $0x70] sm:$0xff]  ;;  %s225_s16 = sshll.u32 %s427_s4, 4  ;;  %s227_s19 = sshll.u32 %s498_s5, 4  ;;  %s226_s16 = int_to_ptr.vmem [resolvable:$true] %s225_s16  ;;  %s228_s19 = int_to_ptr.hbm [resolvable:$true] %s227_s19 }
  0x18   :  { %154 = vmatpush.msra.mxu1 %v152_v3  ;;  %v100_v5 = vld [vmem:[#allocation5] sm:$0xff]  ;;  %v150_v6 = vld [vmem:[#allocation7 + $0x68] sm:$0xff]  ;;  %244 = vmatpush.msra.mxu3 %v152_v3  ;;  %v98_v7 = vld [vmem:[#allocation2] sm:$0xff] }
  0x19   :  { %125 = vmatpush.msra.mxu0 %v102_v1  ;;  %v149_v8 = vld [vmem:[#allocation7 + $0x60] sm:$0xff]  ;;  %v148_v9 = vld [vmem:[#allocation7 + $0x58] sm:$0xff]  ;;  %v147_v10 = vld [vmem:[#allocation7 + $0x50] sm:$0xff] }
  0x1a   :  { %155 = vmatpush.msra.mxu1 %v151_v4  ;;  %245 = vmatpush.msra.mxu3 %v151_v4  ;;  %v146_v11 = vld [vmem:[#allocation7 + $0x48] sm:$0xff]  ;;  %v99_v12 = vld [vmem:[#allocation2 + $0x8] sm:$0xff]  ;;  %v145_v13 = vld [vmem:[#allocation7 + $0x40] sm:$0xff] }
  0x1b   :  { %126 = vmatpush.msra.mxu0 %v101_v2  ;;  %v144_v14 = vld [vmem:[#allocation7 + $0x38] sm:$0xff]  ;;  %v143_v15 = vld [vmem:[#allocation7 + $0x30] sm:$0xff]  ;;  %v142_v16 = vld [vmem:[#allocation7 + $0x28] sm:$0xff] }
  0x1c   :  { %156 = vmatpush.msra.mxu1 %v150_v6  ;;  %246 = vmatpush.msra.mxu3 %v150_v6  ;;  %v141_v17 = vld [vmem:[#allocation7 + $0x20] sm:$0xff]  ;;  %v140_v18 = vld [vmem:[#allocation7 + $0x18] sm:$0xff]  ;;  %v139_v19 = vld [vmem:[#allocation7 + $0x10] sm:$0xff] }
  0x1d   :  { %127 = vmatpush.msra.mxu0 %v100_v5  ;;  %v138_v20 = vld [vmem:[#allocation7 + $0x8] sm:$0xff]  ;;  %v137_v21 = vld [vmem:[#allocation7] sm:$0xff]  ;;  %v194_v22 = vld [vmem:[#allocation8 + $0x78] sm:$0xff] }
  0x1e   :  { %242 = vmatmul.msk.f32.vlgmr.msra.gmra.mxu0 %vm105_vm0, %v98_v7  ;;  %157 = vmatpush.msra.mxu1 %v149_v8  ;;  %v193_v23 = vld [vmem:[#allocation8 + $0x70] sm:$0xff]  ;;  %v192_v24 = vld [vmem:[#allocation8 + $0x68] sm:$0xff]  ;;  %v191_v25 = vld [vmem:[#allocation8 + $0x60] sm:$0xff] }
  0x1f   :  { %247 = vmatpush.msra.mxu3 %v149_v8  ;;  %196 = vmatpush.msra.mxu2 %v194_v22  ;;  %v190_v26 = vld [vmem:[#allocation8 + $0x58] sm:$0xff]  ;;  %v189_v27 = vld [vmem:[#allocation8 + $0x50] sm:$0xff]  ;;  %v188_v28 = vld [vmem:[#allocation8 + $0x48] sm:$0xff] }
  0x20   :  { %158 = vmatpush.msra.mxu1 %v148_v9  ;;  %v187_v29 = vld [vmem:[#allocation8 + $0x40] sm:$0xff]  ;;  %v186_v31 = vld [vmem:[#allocation8 + $0x38] sm:$0xff]  ;;  %v185_v33 = vld [vmem:[#allocation8 + $0x30] sm:$0xff] }
  0x21   :  { %248 = vmatpush.msra.mxu3 %v148_v9  ;;  %197 = vmatpush.msra.mxu2 %v193_v23  ;;  %v97_v30 = vld [vmem:[#allocation10] sm:$0x7]  ;;  %v184_v34 = vld [vmem:[#allocation8 + $0x28] sm:$0xff]  ;;  %v182_v39 = vld [vmem:[#allocation8 + $0x18] sm:$0xff] }
  0x22   :  { %159 = vmatpush.msra.mxu1 %v147_v10  ;;  %v104_v32 = vperm.slane %v97_v30, 0  ;;  %v183_v37 = vld [vmem:[#allocation8 + $0x20] sm:$0xff]  ;;  %v181_v43 = vld [vmem:[#allocation8 + $0x10] sm:$0xff]  ;;  %v180_v44 = vld [vmem:[#allocation8 + $0x8] sm:$0xff]  ;;  %v153_v46 = vperm.slane %v97_v30, 1  ;;  %v195_v53 = vperm.slane %v97_v30, 2 }
  0x23   :  { %249 = vmatpush.msra.mxu3 %v147_v10  ;;  %198 = vmatpush.msra.mxu2 %v192_v24  ;;  %v179_v45 = vld [vmem:[#allocation8] sm:$0xff] }
  0x24   :  { %160 = vmatpush.msra.mxu1 %v146_v11 }
  0x25   :  { %250 = vmatpush.msra.mxu3 %v146_v11  ;;  %199 = vmatpush.msra.mxu2 %v191_v25 }
  0x26   :  { %243 = vmatmul.msk.f32.gmra.mxu0 %vm105_vm0, %v99_v12  ;;  %161 = vmatpush.msra.mxu1 %v145_v13 }
  0x27   :  { %251 = vmatpush.msra.mxu3 %v145_v13  ;;  %200 = vmatpush.msra.mxu2 %v190_v26 }
  0x28   :  { %162 = vmatpush.msra.mxu1 %v144_v14 }
  0x29   :  { %252 = vmatpush.msra.mxu3 %v144_v14  ;;  %201 = vmatpush.msra.mxu2 %v189_v27 }
  0x2a   :  { %163 = vmatpush.msra.mxu1 %v143_v15 }
  0x2b   :  { %253 = vmatpush.msra.mxu3 %v143_v15  ;;  %202 = vmatpush.msra.mxu2 %v188_v28 }
  0x2c   :  { %164 = vmatpush.msra.mxu1 %v142_v16 }
  0x2d   :  { %254 = vmatpush.msra.mxu3 %v142_v16  ;;  %203 = vmatpush.msra.mxu2 %v187_v29 }
  0x2e   :  { %165 = vmatpush.msra.mxu1 %v141_v17 }
  0x2f   :  { %255 = vmatpush.msra.mxu3 %v141_v17  ;;  %204 = vmatpush.msra.mxu2 %v186_v31 }
  0x30   :  { %166 = vmatpush.msra.mxu1 %v140_v18 }
  0x31   :  { %256 = vmatpush.msra.mxu3 %v140_v18  ;;  %205 = vmatpush.msra.mxu2 %v185_v33 }
  0x32   :  { %167 = vmatpush.msra.mxu1 %v139_v19 }
  0x33   :  { %257 = vmatpush.msra.mxu3 %v139_v19  ;;  %206 = vmatpush.msra.mxu2 %v184_v34 }
  0x34   :  { %168 = vmatpush.msra.mxu1 %v138_v20 }
  0x35   :  { %258 = vmatpush.msra.mxu3 %v138_v20  ;;  %207 = vmatpush.msra.mxu2 %v183_v37 }
  0x36   :  { %169 = vmatpush.msra.mxu1 %v137_v21 }
  0x37   :  { %259 = vmatpush.msra.mxu3 %v137_v21  ;;  %208 = vmatpush.msra.mxu2 %v182_v39 }
  0x39   :  { %209 = vmatpush.msra.mxu2 %v181_v43 }
  0x3b   :  { %210 = vmatpush.msra.mxu2 %v180_v44 }
  0x3d   :  { %211 = vmatpush.msra.mxu2 %v179_v45 }
  0x9b   :  { %v129_v35 = vpop.f32.mrf.mxu0 }
  0x9c   :  { %v130_v36 = vadd.f32 %v129_v35, %v104_v32 }
  0x9e   :  { %v135_v38 = vmax.f32 %v130_v36, 0.0 }
  0xa0   :  { %170 = vmatmul.f32.vlgmr.msra.gmra.mxu1 %v135_v38 }
  0xa3   :  { %v132_v40 = vpop.f32.mrf.mxu0 }
  0xa4   :  { %v133_v41 = vadd.f32 %v132_v40, %v104_v32 }
  0xa6   :  { %v136_v42 = vmax.f32 %v133_v41, 0.0 }
  0xa8   :  { %173 = vmatmul.f32.vlgmr.msra.gmra.mxu3 %v136_v42 }
 0x11d   :  { %v171_v47 = vpop.f32.mrf.mxu1 }
 0x11e   :  { %v172_v48 = vadd.f32 %v171_v47, %v153_v46 }
 0x120   :  { %v177_v49 = vmax.f32 %v172_v48, 0.0 }
 0x122   :  { %212 = vmatmul.f32.vlgmr.msra.gmra.mxu2 %v177_v49 }
 0x12b   :  { %v174_v50 = vpop.f32.mrf.mxu3 }
 0x12c   :  { %v175_v51 = vadd.f32 %v174_v50, %v153_v46 }
 0x12e   :  { %v178_v52 = vmax.f32 %v175_v51, 0.0 }
 0x130   :  { %215 = vmatmul.f32.gmra.mxu2 %v178_v52 }
 0x1a5   :  { %v213_v54 = vpop.f32.mrf.mxu2 }
 0x1a6   :  { %v214_v55 = vadd.f32 %v213_v54, %v195_v53 }
 0x1a8   :  { %219 = vst [vmem:[#allocation11] sm:$0xff] %v214_v55 }
 0x1b3   :  { %v216_v56 = vpop.f32.mrf.mxu2 }
 0x1b4   :  { %v217_v57 = vadd.f32 %v216_v56, %v195_v53 }
 0x1b6   :  { %220 = vst [vmem:[#allocation11 + $0x8] sm:$0xff] %v217_v57 }
 0x1b7   :  { %233 = dma.vmem_to_hbm [thread:$0]  %s226_s16, 256, %s228_s19, [#allocation4], %s421_s26, %s421_s26, %s422_s27  }
 0x1b8   :  { %418 = dma.done.wait [#allocation4], 256  }
 0x1b9   :  { %419 = vsyncadd [#allocation4], 4294967040 }
 0x1ba   :  { %238 = vsyncpa [#allocation3], 1 }
 0x1bb   :  { %239 = vsyncpa [#allocation6], 1 }
 0x1bc   :  { %240 = vsyncpa [#allocation9], 1 }
 0x1bd   :  { %241 = vsyncpa [#allocation4], 1 }

</bundles_post_ra>
